<compile_context>
chip_gen: v7x
topology: tpu7x:2x2x1
jax: 0.10.0
libtpu: 0.0.40
codegen_flags: <defaults>
</compile_context>

<pallas_src>
import functools

import jax
import jax.numpy as jnp
from jax.experimental import pallas as pl
from jax.experimental.pallas import tpu as pltpu


def _dice_rows_kernel(yt_ref, yp_ref, out_ref,
                      inter_acc, yt_acc, yp_acc,
                      *, smooth, s_chunk, n_cols, mask_cols):
    j = pl.program_id(1)

    @pl.when(j == 0)
    def _():
        inter_acc[...] = jnp.zeros_like(inter_acc)
        yt_acc[...] = jnp.zeros_like(yt_acc)
        yp_acc[...] = jnp.zeros_like(yp_acc)

    yt = yt_ref[...].astype(jnp.float32)          # (tile_rows, s_chunk)
    yp = yp_ref[...].astype(jnp.float32)

    if mask_cols:
        # Only emitted when S is not a multiple of s_chunk: neutralize the
        # unspecified tail lanes of the last partial spatial chunk.
        col_ids = j * s_chunk + jax.lax.broadcasted_iota(jnp.int32, yt.shape, 1)
        valid = col_ids < n_cols
        yt = jnp.where(valid, yt, 0.0)
        yp = jnp.where(valid, yp, 0.0)

    inter_acc[...] += jnp.sum(yt * yp, axis=-1, keepdims=True)
    yt_acc[...] += jnp.sum(yt, axis=-1, keepdims=True)
    yp_acc[...] += jnp.sum(yp, axis=-1, keepdims=True)

    @pl.when(j == pl.num_programs(1) - 1)
    def _():
        inter = 2.0 * inter_acc[...] + smooth * 0.5
        union = yt_acc[...] + yp_acc[...] + smooth
        out_ref[...] = inter / union              # exact divide (see review)


def _choose_tiles(rows, s, itemsize):
    """Pick (tile_rows, s_chunk) so one input block is ~2 MiB.

    2 inputs x 2 pipeline buffers x 2 MiB = 8 MiB of VMEM for input blocks:
    well past the roofline-saturation size, and safe on v7x's 64 MiB VMEM.
    """
    target_block_bytes = 2 * 1024 * 1024
    # Sublane packing: 8 rows/vreg for 32-bit, 16 for 16-bit, 32 for 8-bit.
    row_align = 8 if itemsize >= 4 else (16 if itemsize == 2 else 32)

    if row_align * s * itemsize <= target_block_bytes:
        # Full-width spatial blocks; grow the row tile.
        s_chunk = s
        cand = (target_block_bytes // (s * itemsize)) // row_align * row_align
        cand = max(cand, row_align)
        tile_rows = min(cand, rows)               # == rows (full dim) if small
    else:
        # Chunk the spatial axis in lane-dense multiples of 128.
        tile_rows = min(row_align, rows)
        cand = (target_block_bytes // (row_align * itemsize)) // 128 * 128
        cand = max(cand, 128)
        s_chunk = min(cand, s)
    return tile_rows, s_chunk


def weighted_dice_coeff(y_true, y_pred, *, smooth=1e-6):
    """Pallas implementation of WeightedDiceCoeff.forward (dim=(-2,-1))."""
    assert y_true.shape == y_pred.shape
    n, c, h, w = y_true.shape
    rows = n * c
    s = h * w

    # One row per (batch, class) pair; lane-dense flattened spatial axis.
    yt = y_true.reshape(rows, s)
    yp = y_pred.reshape(rows, s)

    itemsize = max(jnp.dtype(yt.dtype).itemsize, jnp.dtype(yp.dtype).itemsize)
    tile_rows, s_chunk = _choose_tiles(rows, s, itemsize)

    grid = (pl.cdiv(rows, tile_rows), pl.cdiv(s, s_chunk))
    mask_cols = (s % s_chunk) != 0

    kernel = functools.partial(
        _dice_rows_kernel, smooth=float(smooth), s_chunk=s_chunk,
        n_cols=s, mask_cols=mask_cols)

    per_row_dice = pl.pallas_call(
        kernel,
        out_shape=jax.ShapeDtypeStruct((rows, 1), jnp.float32),
        grid_spec=pltpu.PrefetchScalarGridSpec(
            num_scalar_prefetch=0,
            grid=grid,
            in_specs=[
                pl.BlockSpec((tile_rows, s_chunk), lambda i, j: (i, j)),
                pl.BlockSpec((tile_rows, s_chunk), lambda i, j: (i, j)),
            ],
            out_specs=pl.BlockSpec((tile_rows, 1), lambda i, j: (i, 0)),
            scratch_shapes=[
                pltpu.VMEM((tile_rows, 1), jnp.float32),   # sum(yt*yp)
                pltpu.VMEM((tile_rows, 1), jnp.float32),   # sum(yt)
                pltpu.VMEM((tile_rows, 1), jnp.float32),   # sum(yp)
            ],
        ),
        compiler_params=pltpu.CompilerParams(
            dimension_semantics=("parallel", "arbitrary"),
            vmem_limit_bytes=32 * 1024 * 1024),
    )(yt, yp)

    # Tiny final reduction (N*C scalars) done in plain JAX so the row-tile
    # grid axis can stay "parallel" (both TCs on v7x).
    return jnp.mean(per_row_dice)


def _reference(y_true, y_pred, smooth=1e-6):
    inter = 2.0 * (y_true * y_pred).sum(axis=(-2, -1)) + smooth / 2.0
    union = y_true.sum(axis=(-2, -1)) + y_pred.sum(axis=(-2, -1)) + smooth
    return (inter / union).mean()


if __name__ == "__main__":
    key = jax.random.PRNGKey(0)
    k1, k2 = jax.random.split(key)

    n, c, h, w = 2, 4, 16, 16
    # y_pred acts like post-softmax probabilities; y_true like one-hot masks.
    logits = jax.random.normal(k1, (n, c, h, w), dtype=jnp.float32)
    y_pred = jax.nn.softmax(logits, axis=1)
    labels = jax.random.randint(k2, (n, h, w), 0, c)
    y_true = jax.nn.one_hot(labels, c, axis=1, dtype=jnp.float32)

    out = jax.block_until_ready(weighted_dice_coeff(y_true, y_pred))
    ref = _reference(y_true, y_pred)

    assert jnp.allclose(out, ref, rtol=1e-5, atol=1e-6), (out, ref)
    print("KERNEL_OK")
</pallas_src>

<mosaic_0001>
module attributes {stable_mosaic.version = 11 : i64} {
  func.func @_dice_rows_kernel(%arg0: i32, %arg1: i32, %arg2: memref<8x256xf32, #tpu.memory_space<vmem>>, %arg3: memref<8x256xf32, #tpu.memory_space<vmem>>, %arg4: memref<8x1xf32, #tpu.memory_space<vmem>>, %arg5: memref<8x1xf32, #tpu.memory_space<vmem>>, %arg6: memref<8x1xf32, #tpu.memory_space<vmem>>, %arg7: memref<8x1xf32, #tpu.memory_space<vmem>>) attributes {dimension_semantics = [#tpu.dimension_semantics<parallel>, #tpu.dimension_semantics<arbitrary>], iteration_bounds = array<i64: 1, 1>, scalar_prefetch = 0 : i64, scratch_operands = 3 : i64, tpu.core_type = #tpu.core_type<tc>, window_params = [{transform_indices = @transform_0, window_bounds = array<i64: 8, 256>}, {transform_indices = @transform_1, window_bounds = array<i64: 8, 256>}, {transform_indices = @transform_2, window_bounds = array<i64: 8, 1>}]} {
    %c0_i32 = arith.constant 0 : i32
    %0 = arith.cmpi eq, %arg1, %c0_i32 : i32
    %1 = arith.extui %0 : i1 to i32
    %c0_i32_0 = arith.constant 0 : i32
    %2 = arith.cmpi ne, %1, %c0_i32_0 : i32
    scf.if %2 {
      %cst_20 = arith.constant 0.000000e+00 : f32
      %24 = vector.broadcast %cst_20 : f32 to vector<8x1xf32>
      %c0_21 = arith.constant 0 : index
      %c0_22 = arith.constant 0 : index
      %25 = vector.load %arg5[%c0_21, %c0_22] : memref<8x1xf32, #tpu.memory_space<vmem>>, vector<8x1xf32>
      tpu.vector_store %arg5[%c0_21, %c0_22], %24 {strides = array<i32>} : memref<8x1xf32, #tpu.memory_space<vmem>>, vector<8x1xf32>,
      %cst_23 = arith.constant 0.000000e+00 : f32
      %26 = vector.broadcast %cst_23 : f32 to vector<8x1xf32>
      %c0_24 = arith.constant 0 : index
      %c0_25 = arith.constant 0 : index
      %27 = vector.load %arg6[%c0_24, %c0_25] : memref<8x1xf32, #tpu.memory_space<vmem>>, vector<8x1xf32>
      tpu.vector_store %arg6[%c0_24, %c0_25], %26 {strides = array<i32>} : memref<8x1xf32, #tpu.memory_space<vmem>>, vector<8x1xf32>,
      %cst_26 = arith.constant 0.000000e+00 : f32
      %28 = vector.broadcast %cst_26 : f32 to vector<8x1xf32>
      %c0_27 = arith.constant 0 : index
      %c0_28 = arith.constant 0 : index
      %29 = vector.load %arg7[%c0_27, %c0_28] : memref<8x1xf32, #tpu.memory_space<vmem>>, vector<8x1xf32>
      tpu.vector_store %arg7[%c0_27, %c0_28], %28 {strides = array<i32>} : memref<8x1xf32, #tpu.memory_space<vmem>>, vector<8x1xf32>,
    } else {
    }
    %c0 = arith.constant 0 : index
    %c0_1 = arith.constant 0 : index
    %3 = vector.load %arg2[%c0, %c0_1] : memref<8x256xf32, #tpu.memory_space<vmem>>, vector<8x256xf32>
    %c0_2 = arith.constant 0 : index
    %c0_3 = arith.constant 0 : index
    %4 = vector.load %arg3[%c0_2, %c0_3] : memref<8x256xf32, #tpu.memory_space<vmem>>, vector<8x256xf32>
    %c0_4 = arith.constant 0 : index
    %c0_5 = arith.constant 0 : index
    %5 = vector.load %arg5[%c0_4, %c0_5] : memref<8x1xf32, #tpu.memory_space<vmem>>, vector<8x1xf32>
    %6 = arith.mulf %3, %4 : vector<8x256xf32>
    %cst = arith.constant dense<0.000000e+00> : vector<8xf32>
    %7 = vector.multi_reduction <add>, %6, %cst [1] : vector<8x256xf32> to vector<8xf32>
    %8 = vector.shape_cast %7 : vector<8xf32> to vector<8x1xf32>
    %9 = arith.addf %5, %8 : vector<8x1xf32>
    %c0_6 = arith.constant 0 : index
    %c0_7 = arith.constant 0 : index
    %10 = vector.load %arg5[%c0_6, %c0_7] : memref<8x1xf32, #tpu.memory_space<vmem>>, vector<8x1xf32>
    tpu.vector_store %arg5[%c0_6, %c0_7], %9 {strides = array<i32>} : memref<8x1xf32, #tpu.memory_space<vmem>>, vector<8x1xf32>,
    %c0_8 = arith.constant 0 : index
    %c0_9 = arith.constant 0 : index
    %11 = vector.load %arg6[%c0_8, %c0_9] : memref<8x1xf32, #tpu.memory_space<vmem>>, vector<8x1xf32>
    %cst_10 = arith.constant dense<0.000000e+00> : vector<8xf32>
    %12 = vector.multi_reduction <add>, %3, %cst_10 [1] : vector<8x256xf32> to vector<8xf32>
    %13 = vector.shape_cast %12 : vector<8xf32> to vector<8x1xf32>
    %14 = arith.addf %11, %13 : vector<8x1xf32>
    %c0_11 = arith.constant 0 : index
    %c0_12 = arith.constant 0 : index
    %15 = vector.load %arg6[%c0_11, %c0_12] : memref<8x1xf32, #tpu.memory_space<vmem>>, vector<8x1xf32>
    tpu.vector_store %arg6[%c0_11, %c0_12], %14 {strides = array<i32>} : memref<8x1xf32, #tpu.memory_space<vmem>>, vector<8x1xf32>,
    %c0_13 = arith.constant 0 : index
    %c0_14 = arith.constant 0 : index
    %16 = vector.load %arg7[%c0_13, %c0_14] : memref<8x1xf32, #tpu.memory_space<vmem>>, vector<8x1xf32>
    %cst_15 = arith.constant dense<0.000000e+00> : vector<8xf32>
    %17 = vector.multi_reduction <add>, %4, %cst_15 [1] : vector<8x256xf32> to vector<8xf32>
    %18 = vector.shape_cast %17 : vector<8xf32> to vector<8x1xf32>
    %19 = arith.addf %16, %18 : vector<8x1xf32>
    %c0_16 = arith.constant 0 : index
    %c0_17 = arith.constant 0 : index
    %20 = vector.load %arg7[%c0_16, %c0_17] : memref<8x1xf32, #tpu.memory_space<vmem>>, vector<8x1xf32>
    tpu.vector_store %arg7[%c0_16, %c0_17], %19 {strides = array<i32>} : memref<8x1xf32, #tpu.memory_space<vmem>>, vector<8x1xf32>,
    %c0_i32_18 = arith.constant 0 : i32
    %21 = arith.cmpi eq, %arg1, %c0_i32_18 : i32
    %22 = arith.extui %21 : i1 to i32
    %c0_i32_19 = arith.constant 0 : i32
    %23 = arith.cmpi ne, %22, %c0_i32_19 : i32
    scf.if %23 {
      %c0_20 = arith.constant 0 : index
      %c0_21 = arith.constant 0 : index
      %24 = vector.load %arg5[%c0_20, %c0_21] : memref<8x1xf32, #tpu.memory_space<vmem>>, vector<8x1xf32>
      %cst_22 = arith.constant 2.000000e+00 : f32
      %25 = vector.broadcast %cst_22 : f32 to vector<8x1xf32>
      %26 = arith.mulf %25, %24 : vector<8x1xf32>
      %cst_23 = arith.constant 5.000000e-07 : f32
      %27 = vector.broadcast %cst_23 : f32 to vector<8x1xf32>
      %28 = arith.addf %26, %27 : vector<8x1xf32>
      %c0_24 = arith.constant 0 : index
      %c0_25 = arith.constant 0 : index
      %29 = vector.load %arg6[%c0_24, %c0_25] : memref<8x1xf32, #tpu.memory_space<vmem>>, vector<8x1xf32>
      %c0_26 = arith.constant 0 : index
      %c0_27 = arith.constant 0 : index
      %30 = vector.load %arg7[%c0_26, %c0_27] : memref<8x1xf32, #tpu.memory_space<vmem>>, vector<8x1xf32>
      %31 = arith.addf %29, %30 : vector<8x1xf32>
      %cst_28 = arith.constant 9.99999997E-7 : f32
      %32 = vector.broadcast %cst_28 : f32 to vector<8x1xf32>
      %33 = arith.addf %31, %32 : vector<8x1xf32>
      %34 = arith.divf %28, %33 : vector<8x1xf32>
      %c0_29 = arith.constant 0 : index
      %c0_30 = arith.constant 0 : index
      %35 = vector.load %arg4[%c0_29, %c0_30] : memref<8x1xf32, #tpu.memory_space<vmem>>, vector<8x1xf32>
      tpu.vector_store %arg4[%c0_29, %c0_30], %34 {strides = array<i32>} : memref<8x1xf32, #tpu.memory_space<vmem>>, vector<8x1xf32>,
    } else {
    }
    return
  }
  func.func @transform_0(%arg0: i32, %arg1: i32) -> (i32, i32) {
    %c0_i32 = arith.constant 0 : i32
    return %arg0, %arg1 : i32, i32
  }
  func.func @transform_1(%arg0: i32, %arg1: i32) -> (i32, i32) {
    %c0_i32 = arith.constant 0 : i32
    return %arg0, %arg1 : i32, i32
  }
  func.func @transform_2(%arg0: i32, %arg1: i32) -> (i32, i32) {
    %c0_i32 = arith.constant 0 : i32
    %c0_i32_0 = arith.constant 0 : i32
    return %arg0, %c0_i32 : i32, i32
  }
}

</mosaic_0001>

<bundles_post_ra>
// kernel: tpu_custom_call.1
= control target key start
LH: loop header
LB: loop body
LE: loop exit
PB: predicated region body
PF: predicated region fallthrough
CT: control target
= control target key end

     0   :  { %7 = vsyncpa [#allocation6], 0  ;;  %s192_s0 = inlined_call_operand.hbm [shape: f32[8,256], index: 0, kind: input, shape index: {}]   ;;  %s193_s1 = inlined_call_operand.hbm [shape: f32[8,256], index: 1, kind: input, shape index: {}]   ;;  %s194_s2 = inlined_call_operand.vmem [shape: f32[8,1], index: 2, kind: output, shape index: {}]  }
   0x1   :  { %8 = vsyncpa [#allocation8], 0  ;;  %s140_s9 = smov [#allocation5]   ;;  %s141_s11 = smov [#allocation7]  }
   0x2   :  { %s15_s10 = sshll.u32 %s140_s9, 4  ;;  %s25_s12 = sshll.u32 %s141_s11, 4  ;;  %s16_s10 = int_to_ptr.vmem [resolvable:$true] %s15_s10  ;;  %s26_s12 = int_to_ptr.vmem [resolvable:$true] %s25_s12 }
   0x3   :  { %s92_s15 = scalar_lea.hbm %s192_s0, 256 }
   0x4   :  { %p93_p0 = scmp.ne.s32.totalorder %s192_s0, %s92_s15  ;;  %p96_p1 = scmp.lt.u32.totalorder %s92_s15, %s192_s0 }
   0x6   :  { %p98_p2 = pnand %p96_p1, %p93_p0 }
   0x8   :  { %101 = shalt.err (!%p98_p2)
}
   0x9   :  { %s102_s20 = scalar_lea.vmem %s16_s10, 256  ;;  %p107_p4 = scmp.lt.s32.totalorder %s16_s10, %s16_s10 }
   0xa   :  { %p103_p3 = scmp.ne.s32.totalorder %s16_s10, %s102_s20  ;;  %p108_p5 = scmp.lt.s32.totalorder %s102_s20, %s102_s20 }
   0xc   :  { %p109_p6 = por %p108_p5, %p107_p4 }
   0xe   :  { %p110_p7 = pnand %p109_p6, %p103_p3 }
  0x10   :  { %113 = shalt.err (!%p110_p7)
}
  0x11   :  { %18 = dma.hbm_to_vmem [thread:$0]  %s192_s0, 256, %s16_s10, [#allocation6]  }
  0x12   :  { %s114_s25 = scalar_lea.hbm %s193_s1, 256 }
  0x13   :  { %p115_p8 = scmp.ne.s32.totalorder %s193_s1, %s114_s25  ;;  %p118_p9 = scmp.lt.u32.totalorder %s114_s25, %s193_s1 }
  0x15   :  { %p120_p10 = pnand %p118_p9, %p115_p8 }
  0x17   :  { %123 = shalt.err (!%p120_p10)
}
  0x18   :  { %s124_s30 = scalar_lea.vmem %s26_s12, 256  ;;  %p129_p12 = scmp.lt.s32.totalorder %s26_s12, %s26_s12 }
  0x19   :  { %p125_p11 = scmp.ne.s32.totalorder %s26_s12, %s124_s30  ;;  %p130_p13 = scmp.lt.s32.totalorder %s124_s30, %s124_s30 }
  0x1b   :  { %p131_p0 = por %p130_p13, %p129_p12 }
  0x1d   :  { %p132_p1 = pnand %p131_p0, %p125_p11 }
  0x1f   :  { %135 = shalt.err (!%p132_p1)
}
  0x20   :  { %28 = dma.hbm_to_vmem [thread:$0]  %s193_s1, 256, %s26_s12, [#allocation8]  }
  0x21   :  { %136 = dma.done.wait [#allocation6], 256  }
  0x22   :  { %137 = vsyncadd [#allocation6], 4294967040 }
  0x23   :  { %138 = dma.done.wait [#allocation8], 256  }
  0x24   :  { %139 = vsyncadd [#allocation8], 4294967040  ;;  %vm39_vm0 = vcmask 7168   ;;  %v142_v0 = vmov 0.0   ;;  %v43_v1 = vld [vmem:[#allocation5] sm:$0xff]  ;;  %v44_v2 = vld [vmem:[#allocation5 + $0x8] sm:$0xff] }
  0x25   :  { %41 = vst.msk [vmem:[#allocation3] sm:$0xff] %vm39_vm0, %v142_v0  ;;  %40 = vst.msk [vmem:[#allocation2] sm:$0xff] %vm39_vm0, %v142_v0  ;;  %v45_v3 = vld [vmem:[#allocation7] sm:$0xff]  ;;  %v57_v4 = vadd.f32 %v44_v2, %v43_v1  ;;  %v46_v5 = vld [vmem:[#allocation7 + $0x8] sm:$0xff] }
  0x26   :  { %42 = vst.msk [vmem:[#allocation4] sm:$0xff] %vm39_vm0, %v142_v0  ;;  %v48_v6 = vmul.f32 %v45_v3, %v43_v1  ;;  %v49_v7 = vmul.f32 %v46_v5, %v44_v2  ;;  %v63_v8 = vadd.f32 %v46_v5, %v45_v3 }
  0x27   :  { %58 = vadd.xlane.f32.xlu0 %v57_v4 }
  0x28   :  { %v50_v9 = vadd.f32 %v49_v7, %v48_v6 }
  0x2a   :  { %51 = vadd.xlane.f32.xlu1 %v50_v9 }
  0x2b   :  { %64 = vadd.xlane.f32.xlu0 %v63_v8 }
  0x2c   :  { %v56_v10 = vld [vmem:[#allocation3] sm:$0xff]  ;;  %v47_v13 = vld [vmem:[#allocation2] sm:$0xff] }
  0x2d   :  { %v62_v14 = vld [vmem:[#allocation4] sm:$0xff] }
  0xb4   :  { %v59_v11 = vpop.xlane.xlu0 %58 }
  0xb5   :  { %v60_v12 = vadd.f32 %v59_v11, %v56_v10 }
  0xb7   :  { %61 = vst.msk [vmem:[#allocation3] sm:$0xff] %vm39_vm0, %v60_v12  ;;  %v52_v15 = vpop.xlane.xlu1 %51 }
  0xb8   :  { %v65_v16 = vpop.xlane.xlu0 %64  ;;  %v53_v17 = vadd.f32 %v52_v15, %v47_v13 }
  0xb9   :  { %v66_v18 = vadd.f32 %v65_v16, %v62_v14 }
  0xba   :  { %55 = vst.msk [vmem:[#allocation2] sm:$0xff] %vm39_vm0, %v53_v17 }
  0xbb   :  { %67 = vst.msk [vmem:[#allocation4] sm:$0xff] %vm39_vm0, %v66_v18 }
  0xbe   :  { %v74_v19 = vld [vmem:[#allocation3] sm:$0xff] }
  0xc1   :  { %v71_v23 = vld [vmem:[#allocation2] sm:$0xff] }
  0xc2   :  { %v75_v20 = vld [vmem:[#allocation4] sm:$0xff]  ;;  %v72_v24 = vmul.f32 2.0, %v71_v23 }
  0xc3   :  { %v76_v21 = vadd.f32 %v75_v20, %v74_v19 }
  0xc4   :  { %v73_v25 = vadd.f32 5e-07, %v72_v24 }
  0xc5   :  { %v77_v22 = vadd.f32 1e-06, %v76_v21 }
  0xc7   :  { %90 = vrcp.f32 %v77_v22 }
  0xd1   :  { %v91_v26 = vpop.eup %90 }
  0xd2   :  { %v79_v27 = vmul.f32 %v91_v26, %v73_v25 }
  0xd4   :  { %80 = vst.msk [vmem:[%s194_s2] sm:$0xff] %vm39_vm0, %v79_v27 }
  0xd5   :  { %85 = vsyncpa [#allocation6], 1 }
  0xd6   :  { %86 = vsyncpa [#allocation8], 1 }

</bundles_post_ra>
